<compile_context>
chip_gen: v6e
topology: v6e:2x2x1
jax: 0.10.0
libtpu: 0.0.40
codegen_flags: <defaults>
</compile_context>

<pallas_src>
import jax
import jax.numpy as jnp
from jax.experimental import pallas as pl
from jax.experimental.pallas import tpu as pltpu

# ---- small config consistent with the module -------------------------------
B = 2      # batch
S = 8      # enc_seq_len
E = 32     # n_embed
H = 4      # n_heads
P = 32     # n_proj
FF = 64    # n_ffn
DH = P // H
EPS = 1e-6


# ---- fused kernel: whole (B, S, E) problem in a single grid step ------------
def encoder_block_kernel(x_ref, pos_ref, ln0_ref, ln1_ref,
                         wqkv_ref, wo_ref, wi_ref, wof_ref, out_ref):
    # x is presented as (B*S, E) rows for lane/sublane-dense projections.
    x = x_ref[...].astype(jnp.float32)                       # (B*S, E)

    # --- LayerNorm 0 (T5 RMS norm: rescale only, no bias/mean) ---
    var0 = jnp.mean(x * x, axis=-1, keepdims=True)
    xn0 = (x * jax.lax.rsqrt(var0 + EPS)) * ln0_ref[0]

    # --- fused QKV projection: one (16, 96) matmul ---
    qkv = jnp.dot(xn0, wqkv_ref[...], preferred_element_type=jnp.float32)  # (B*S, 3P)
    wo = wo_ref[...]                                          # (P, E)
    pos = pos_ref[0]                                          # (H, S, S)

    # --- self-attention (non-causal, additive T5 position bias).
    # HF T5 does NOT scale scores by 1/sqrt(d); the torch code cancels SDPA's
    # scaling by pre-multiplying q,k with d^(1/4).  Net: scores = q @ k^T + pos.
    # Per-head outputs are accumulated directly through the matching slice of
    # Wo, so no lane-dim concatenate is needed.
    attn_blocks = []
    for b in range(B):                 # static unroll, B=2
        r = b * S
        attn_b = jnp.zeros((S, E), jnp.float32)
        for h in range(H):             # static unroll, H=4
            c = h * DH
            qh = qkv[r:r + S, c:c + DH]                       # (S, DH)
            kh = qkv[r:r + S, P + c:P + c + DH]               # (S, DH)
            vh = qkv[r:r + S, 2 * P + c:2 * P + c + DH]       # (S, DH)
            scores = jax.lax.dot_general(
                qh, kh, (((1,), (1,)), ((), ())),
                preferred_element_type=jnp.float32) + pos[h]  # (S, S)
            scores = scores - jnp.max(scores, axis=-1, keepdims=True)
            e = jnp.exp(scores)
            probs = e * pl.reciprocal(jnp.sum(e, axis=-1, keepdims=True),
                                      approx=True)
            head = jnp.dot(probs, vh, preferred_element_type=jnp.float32)  # (S, DH)
            attn_b = attn_b + jnp.dot(head, wo[c:c + DH, :],
                                      preferred_element_type=jnp.float32)  # (S, E)
        attn_blocks.append(attn_b)
    # axis-0 (sublane) concat at an 8-row tile boundary: no lane movement.
    attn_out = jnp.concatenate(attn_blocks, axis=0)           # (B*S, E)

    x1 = x + attn_out            # residual (dropout1 = identity in eval)

    # --- LayerNorm 1 + gated FFN (GeGLU with tanh-approx GELU) ---
    var1 = jnp.mean(x1 * x1, axis=-1, keepdims=True)
    xn1 = (x1 * jax.lax.rsqrt(var1 + EPS)) * ln1_ref[0]

    # fused wi_0|wi_1: single (16, 128) lane-dense matmul result.
    gf = jnp.dot(xn1, wi_ref[...], preferred_element_type=jnp.float32)     # (B*S, 2*FF)
    hidden = jax.nn.gelu(gf[:, :FF], approximate=True) * gf[:, FF:]
    ffn_out = jnp.dot(hidden, wof_ref[...], preferred_element_type=jnp.float32)

    out_ref[...] = (x1 + ffn_out).astype(out_ref.dtype)  # residual (dropout2 = id)


def encoder_block(x, pos, params):
    ln0, ln1, wq, wk, wv, wo, wi0, wi1, wof = params
    # Fuse weights at the wrapper boundary (traced; folded by XLA under jit).
    wqkv = jnp.concatenate([wq, wk, wv], axis=1)     # (E, 3P)
    wi = jnp.concatenate([wi0, wi1], axis=1)         # (E, 2*FF) = (32, 128)
    tokens = B * S
    x2d = x.reshape(tokens, E)                       # free reshape outside kernel

    # Advisory cost hint for the XLA scheduler.
    flops = (2 * tokens * (3 * E * P + P * E + 2 * E * FF + FF * E)
             + B * H * 4 * S * S * DH)
    transcendentals = B * H * S * S + tokens * FF + 2 * tokens + B * H * S
    bytes_accessed = 4 * (2 * tokens * E + H * S * S + 2 * E
                          + E * 3 * P + P * E + E * 2 * FF + FF * E)

    const = lambda shape: pl.BlockSpec(shape, lambda i: (0,) * len(shape))
    out2d = pl.pallas_call(
        encoder_block_kernel,
        out_shape=jax.ShapeDtypeStruct((tokens, E), jnp.float32),
        grid=(1,),
        in_specs=[
            const((tokens, E)),        # x (B*S, E)
            const((1, H, S, S)),       # pos bias
            const((1, E)),             # ln0 weight
            const((1, E)),             # ln1 weight
            const((E, 3 * P)),         # fused Wqkv
            const((P, E)),             # Wo (attn out proj)
            const((E, 2 * FF)),        # fused wi_0 | wi_1
            const((FF, E)),            # Wo (ffn)
        ],
        out_specs=pl.BlockSpec((tokens, E), lambda i: (0, 0)),
        compiler_params=pltpu.CompilerParams(
            dimension_semantics=("arbitrary",)),
        cost_estimate=pl.CostEstimate(flops=flops,
                                      transcendentals=transcendentals,
                                      bytes_accessed=bytes_accessed),
    )(x2d, pos, ln0, ln1, wqkv, wo, wi, wof)
    return out2d.reshape(B, S, E)


# ---- pure-JAX reference (mirrors the PyTorch forward exactly) ---------------
def ref_forward(x, pos, params):
    ln0, ln1, wq, wk, wv, wo, wi0, wi1, wof = params

    def rms(h, w):
        var = jnp.mean(h.astype(jnp.float32) ** 2, axis=-1, keepdims=True)
        return w * (h * jax.lax.rsqrt(var + EPS))

    xn = rms(x, ln0[0])
    q = (xn @ wq).reshape(B, S, H, DH).transpose(0, 2, 1, 3)
    k = (xn @ wk).reshape(B, S, H, DH).transpose(0, 2, 1, 3)
    v = (xn @ wv).reshape(B, S, H, DH).transpose(0, 2, 1, 3)
    scores = jnp.einsum("bhqd,bhkd->bhqk", q, k) + pos
    probs = jax.nn.softmax(scores, axis=-1)
    att = jnp.einsum("bhqk,bhkd->bhqd", probs, v)
    att = att.transpose(0, 2, 1, 3).reshape(B, S, P)
    x1 = x + att @ wo
    xn1 = rms(x1, ln1[0])
    hidden = jax.nn.gelu(xn1 @ wi0, approximate=True) * (xn1 @ wi1)
    return x1 + hidden @ wof


if __name__ == "__main__":
    key = jax.random.PRNGKey(0)
    keys = jax.random.split(key, 12)
    scale = 0.05
    x = jax.random.normal(keys[0], (B, S, E), jnp.float32)
    pos = jax.random.normal(keys[1], (1, H, S, S), jnp.float32) * 0.1
    params = (
        jnp.ones((1, E), jnp.float32),                                  # ln_0.weight
        jnp.ones((1, E), jnp.float32),                                  # ln_1.weight
        jax.random.normal(keys[2], (E, P), jnp.float32) * scale,        # q_proj
        jax.random.normal(keys[3], (E, P), jnp.float32) * scale,        # k_proj
        jax.random.normal(keys[4], (E, P), jnp.float32) * scale,        # v_proj
        jax.random.normal(keys[5], (P, E), jnp.float32) * scale,        # o_proj
        jax.random.normal(keys[6], (E, FF), jnp.float32) * scale,       # wi_0
        jax.random.normal(keys[7], (E, FF), jnp.float32) * scale,       # wi_1
        jax.random.normal(keys[8], (FF, E), jnp.float32) * scale,       # wo (ffn)
    )

    out = encoder_block(x, pos, params)
    out = jax.block_until_ready(out)

    ref = ref_forward(x, pos, params)
    assert out.shape == (B, S, E)
    # Tolerance slightly loosened because the kernel's softmax denominator uses
    # the EUP approximate reciprocal (pl.reciprocal(..., approx=True)).
    assert jnp.allclose(out, ref, atol=2e-3, rtol=2e-3), (
        f"max abs err {jnp.max(jnp.abs(out - ref))}")
    print("KERNEL_OK")
</pallas_src>

<mosaic_0001>
module attributes {stable_mosaic.version = 11 : i64} {
  func.func @encoder_block_kernel(%arg0: i32, %arg1: memref<16x32xf32, #tpu.memory_space<vmem>>, %arg2: memref<1x4x8x8xf32, #tpu.memory_space<vmem>>, %arg3: memref<1x32xf32, #tpu.memory_space<vmem>>, %arg4: memref<1x32xf32, #tpu.memory_space<vmem>>, %arg5: memref<32x96xf32, #tpu.memory_space<vmem>>, %arg6: memref<32x32xf32, #tpu.memory_space<vmem>>, %arg7: memref<32x128xf32, #tpu.memory_space<vmem>>, %arg8: memref<64x32xf32, #tpu.memory_space<vmem>>, %arg9: memref<16x32xf32, #tpu.memory_space<vmem>>) attributes {dimension_semantics = [#tpu.dimension_semantics<arbitrary>], iteration_bounds = array<i64: 1>, scalar_prefetch = 0 : i64, scratch_operands = 0 : i64, tpu.core_type = #tpu.core_type<tc>, window_params = [{pipeline_mode = #tpu.pipeline_mode<synchronous>, transform_indices = @transform_0, window_bounds = array<i64: 16, 32>}, {pipeline_mode = #tpu.pipeline_mode<synchronous>, transform_indices = @transform_1, window_bounds = array<i64: 1, 4, 8, 8>}, {pipeline_mode = #tpu.pipeline_mode<synchronous>, transform_indices = @transform_2, window_bounds = array<i64: 1, 32>}, {pipeline_mode = #tpu.pipeline_mode<synchronous>, transform_indices = @transform_3, window_bounds = array<i64: 1, 32>}, {pipeline_mode = #tpu.pipeline_mode<synchronous>, transform_indices = @transform_4, window_bounds = array<i64: 32, 96>}, {pipeline_mode = #tpu.pipeline_mode<synchronous>, transform_indices = @transform_5, window_bounds = array<i64: 32, 32>}, {pipeline_mode = #tpu.pipeline_mode<synchronous>, transform_indices = @transform_6, window_bounds = array<i64: 32, 128>}, {pipeline_mode = #tpu.pipeline_mode<synchronous>, transform_indices = @transform_7, window_bounds = array<i64: 64, 32>}, {pipeline_mode = #tpu.pipeline_mode<synchronous>, transform_indices = @transform_8, window_bounds = array<i64: 16, 32>}]} {
    %c0 = arith.constant 0 : index
    %c0_0 = arith.constant 0 : index
    %0 = vector.load %arg1[%c0, %c0_0] : memref<16x32xf32, #tpu.memory_space<vmem>>, vector<16x32xf32>
    %1 = arith.mulf %0, %0 : vector<16x32xf32>
    %cst = arith.constant dense<0.000000e+00> : vector<16xf32>
    %2 = vector.multi_reduction <add>, %1, %cst [1] : vector<16x32xf32> to vector<16xf32>
    %3 = vector.shape_cast %2 : vector<16xf32> to vector<16x1xf32>
    %cst_1 = arith.constant 3.200000e+01 : f32
    %4 = vector.broadcast %cst_1 : f32 to vector<16x1xf32>
    %5 = arith.divf %3, %4 : vector<16x1xf32>
    %cst_2 = arith.constant 9.99999997E-7 : f32
    %6 = vector.broadcast %cst_2 : f32 to vector<16x1xf32>
    %7 = arith.addf %5, %6 : vector<16x1xf32>
    %8 = math.rsqrt %7 : vector<16x1xf32>
    %9 = vector.broadcast %8 : vector<16x1xf32> to vector<16x32xf32>
    %10 = arith.mulf %0, %9 : vector<16x32xf32>
    %c0_3 = arith.constant 0 : index
    %c0_4 = arith.constant 0 : index
    %11 = vector.load %arg3[%c0_3, %c0_4] : memref<1x32xf32, #tpu.memory_space<vmem>>, vector<1x32xf32>
    %12 = vector.shape_cast %11 : vector<1x32xf32> to vector<32xf32>
    %13 = vector.shape_cast %12 : vector<32xf32> to vector<1x32xf32>
    %14 = vector.broadcast %13 : vector<1x32xf32> to vector<16x32xf32>
    %15 = arith.mulf %10, %14 : vector<16x32xf32>
    %c0_5 = arith.constant 0 : index
    %c0_6 = arith.constant 0 : index
    %16 = vector.load %arg5[%c0_5, %c0_6] : memref<32x96xf32, #tpu.memory_space<vmem>>, vector<32x96xf32>
    %cst_7 = arith.constant dense<0.000000e+00> : vector<16x96xf32>
    %17 = tpu.matmul %15, %16, %cst_7 {dimension_numbers = #tpu.dot_dimension_numbers<[1], [0], [0], [1], [0, 0, 1, 1], [], []>} : vector<16x32xf32>, vector<32x96xf32>, vector<16x96xf32> -> vector<16x96xf32>
    %c0_8 = arith.constant 0 : index
    %c0_9 = arith.constant 0 : index
    %18 = vector.load %arg6[%c0_8, %c0_9] : memref<32x32xf32, #tpu.memory_space<vmem>>, vector<32x32xf32>
    %c0_10 = arith.constant 0 : index
    %c0_11 = arith.constant 0 : index
    %c0_12 = arith.constant 0 : index
    %c0_13 = arith.constant 0 : index
    %19 = vector.load %arg2[%c0_10, %c0_11, %c0_12, %c0_13] : memref<1x4x8x8xf32, #tpu.memory_space<vmem>>, vector<1x4x8x8xf32>
    %20 = vector.shape_cast %19 : vector<1x4x8x8xf32> to vector<4x8x8xf32>
    %cst_14 = arith.constant 0.000000e+00 : f32
    %21 = vector.broadcast %cst_14 : f32 to vector<8x32xf32>
    %22 = vector.extract_strided_slice %17 {offsets = [0, 0], sizes = [8, 8], strides = [1, 1]} : vector<16x96xf32> to vector<8x8xf32>
    %23 = vector.extract_strided_slice %17 {offsets = [0, 32], sizes = [8, 8], strides = [1, 1]} : vector<16x96xf32> to vector<8x8xf32>
    %24 = vector.extract_strided_slice %17 {offsets = [0, 64], sizes = [8, 8], strides = [1, 1]} : vector<16x96xf32> to vector<8x8xf32>
    %cst_15 = arith.constant dense<0.000000e+00> : vector<8x8xf32>
    %25 = tpu.matmul %22, %23, %cst_15 {dimension_numbers = #tpu.dot_dimension_numbers<[1], [1], [0], [0], [0, 0, 1, 0], [], []>} : vector<8x8xf32>, vector<8x8xf32>, vector<8x8xf32> -> vector<8x8xf32>
    %26 = vector.extract_strided_slice %20 {offsets = [0, 0, 0], sizes = [1, 8, 8], strides = [1, 1, 1]} : vector<4x8x8xf32> to vector<1x8x8xf32>
    %27 = vector.shape_cast %26 : vector<1x8x8xf32> to vector<8x8xf32>
    %28 = arith.addf %25, %27 : vector<8x8xf32>
    %cst_16 = arith.constant dense<0xFF800000> : vector<8xf32>
    %29 = vector.multi_reduction <maximumf>, %28, %cst_16 [1] : vector<8x8xf32> to vector<8xf32>
    %30 = vector.shape_cast %29 : vector<8xf32> to vector<8x1xf32>
    %31 = vector.broadcast %30 : vector<8x1xf32> to vector<8x8xf32>
    %32 = arith.subf %28, %31 : vector<8x8xf32>
    %33 = math.exp %32 : vector<8x8xf32>
    %cst_17 = arith.constant dense<0.000000e+00> : vector<8xf32>
    %34 = vector.multi_reduction <add>, %33, %cst_17 [1] : vector<8x8xf32> to vector<8xf32>
    %35 = vector.shape_cast %34 : vector<8xf32> to vector<8x1xf32>
    %36 = tpu.reciprocal %35 {approx = true} : vector<8x1xf32> -> vector<8x1xf32>
    %37 = vector.broadcast %36 : vector<8x1xf32> to vector<8x8xf32>
    %38 = arith.mulf %33, %37 : vector<8x8xf32>
    %cst_18 = arith.constant dense<0.000000e+00> : vector<8x8xf32>
    %39 = tpu.matmul %38, %24, %cst_18 {dimension_numbers = #tpu.dot_dimension_numbers<[1], [0], [0], [1], [0, 0, 1, 1], [], []>} : vector<8x8xf32>, vector<8x8xf32>, vector<8x8xf32> -> vector<8x8xf32>
    %40 = vector.extract_strided_slice %18 {offsets = [0, 0], sizes = [8, 32], strides = [1, 1]} : vector<32x32xf32> to vector<8x32xf32>
    %cst_19 = arith.constant dense<0.000000e+00> : vector<8x32xf32>
    %41 = tpu.matmul %39, %40, %cst_19 {dimension_numbers = #tpu.dot_dimension_numbers<[1], [0], [0], [1], [0, 0, 1, 1], [], []>} : vector<8x8xf32>, vector<8x32xf32>, vector<8x32xf32> -> vector<8x32xf32>
    %42 = arith.addf %21, %41 : vector<8x32xf32>
    %43 = vector.extract_strided_slice %17 {offsets = [0, 8], sizes = [8, 8], strides = [1, 1]} : vector<16x96xf32> to vector<8x8xf32>
    %44 = vector.extract_strided_slice %17 {offsets = [0, 40], sizes = [8, 8], strides = [1, 1]} : vector<16x96xf32> to vector<8x8xf32>
    %45 = vector.extract_strided_slice %17 {offsets = [0, 72], sizes = [8, 8], strides = [1, 1]} : vector<16x96xf32> to vector<8x8xf32>
    %cst_20 = arith.constant dense<0.000000e+00> : vector<8x8xf32>
    %46 = tpu.matmul %43, %44, %cst_20 {dimension_numbers = #tpu.dot_dimension_numbers<[1], [1], [0], [0], [0, 0, 1, 0], [], []>} : vector<8x8xf32>, vector<8x8xf32>, vector<8x8xf32> -> vector<8x8xf32>
    %47 = vector.extract_strided_slice %20 {offsets = [1, 0, 0], sizes = [1, 8, 8], strides = [1, 1, 1]} : vector<4x8x8xf32> to vector<1x8x8xf32>
    %48 = vector.shape_cast %47 : vector<1x8x8xf32> to vector<8x8xf32>
    %49 = arith.addf %46, %48 : vector<8x8xf32>
    %cst_21 = arith.constant dense<0xFF800000> : vector<8xf32>
    %50 = vector.multi_reduction <maximumf>, %49, %cst_21 [1] : vector<8x8xf32> to vector<8xf32>
    %51 = vector.shape_cast %50 : vector<8xf32> to vector<8x1xf32>
    %52 = vector.broadcast %51 : vector<8x1xf32> to vector<8x8xf32>
    %53 = arith.subf %49, %52 : vector<8x8xf32>
    %54 = math.exp %53 : vector<8x8xf32>
    %cst_22 = arith.constant dense<0.000000e+00> : vector<8xf32>
    %55 = vector.multi_reduction <add>, %54, %cst_22 [1] : vector<8x8xf32> to vector<8xf32>
    %56 = vector.shape_cast %55 : vector<8xf32> to vector<8x1xf32>
    %57 = tpu.reciprocal %56 {approx = true} : vector<8x1xf32> -> vector<8x1xf32>
    %58 = vector.broadcast %57 : vector<8x1xf32> to vector<8x8xf32>
    %59 = arith.mulf %54, %58 : vector<8x8xf32>
    %cst_23 = arith.constant dense<0.000000e+00> : vector<8x8xf32>
    %60 = tpu.matmul %59, %45, %cst_23 {dimension_numbers = #tpu.dot_dimension_numbers<[1], [0], [0], [1], [0, 0, 1, 1], [], []>} : vector<8x8xf32>, vector<8x8xf32>, vector<8x8xf32> -> vector<8x8xf32>
    %61 = vector.extract_strided_slice %18 {offsets = [8, 0], sizes = [8, 32], strides = [1, 1]} : vector<32x32xf32> to vector<8x32xf32>
    %cst_24 = arith.constant dense<0.000000e+00> : vector<8x32xf32>
    %62 = tpu.matmul %60, %61, %cst_24 {dimension_numbers = #tpu.dot_dimension_numbers<[1], [0], [0], [1], [0, 0, 1, 1], [], []>} : vector<8x8xf32>, vector<8x32xf32>, vector<8x32xf32> -> vector<8x32xf32>
    %63 = arith.addf %42, %62 : vector<8x32xf32>
    %64 = vector.extract_strided_slice %17 {offsets = [0, 16], sizes = [8, 8], strides = [1, 1]} : vector<16x96xf32> to vector<8x8xf32>
    %65 = vector.extract_strided_slice %17 {offsets = [0, 48], sizes = [8, 8], strides = [1, 1]} : vector<16x96xf32> to vector<8x8xf32>
    %66 = vector.extract_strided_slice %17 {offsets = [0, 80], sizes = [8, 8], strides = [1, 1]} : vector<16x96xf32> to vector<8x8xf32>
    %cst_25 = arith.constant dense<0.000000e+00> : vector<8x8xf32>
    %67 = tpu.matmul %64, %65, %cst_25 {dimension_numbers = #tpu.dot_dimension_numbers<[1], [1], [0], [0], [0, 0, 1, 0], [], []>} : vector<8x8xf32>, vector<8x8xf32>, vector<8x8xf32> -> vector<8x8xf32>
    %68 = vector.extract_strided_slice %20 {offsets = [2, 0, 0], sizes = [1, 8, 8], strides = [1, 1, 1]} : vector<4x8x8xf32> to vector<1x8x8xf32>
    %69 = vector.shape_cast %68 : vector<1x8x8xf32> to vector<8x8xf32>
    %70 = arith.addf %67, %69 : vector<8x8xf32>
    %cst_26 = arith.constant dense<0xFF800000> : vector<8xf32>
    %71 = vector.multi_reduction <maximumf>, %70, %cst_26 [1] : vector<8x8xf32> to vector<8xf32>
    %72 = vector.shape_cast %71 : vector<8xf32> to vector<8x1xf32>
    %73 = vector.broadcast %72 : vector<8x1xf32> to vector<8x8xf32>
    %74 = arith.subf %70, %73 : vector<8x8xf32>
    %75 = math.exp %74 : vector<8x8xf32>
    %cst_27 = arith.constant dense<0.000000e+00> : vector<8xf32>
    %76 = vector.multi_reduction <add>, %75, %cst_27 [1] : vector<8x8xf32> to vector<8xf32>
    %77 = vector.shape_cast %76 : vector<8xf32> to vector<8x1xf32>
    %78 = tpu.reciprocal %77 {approx = true} : vector<8x1xf32> -> vector<8x1xf32>
    %79 = vector.broadcast %78 : vector<8x1xf32> to vector<8x8xf32>
    %80 = arith.mulf %75, %79 : vector<8x8xf32>
    %cst_28 = arith.constant dense<0.000000e+00> : vector<8x8xf32>
    %81 = tpu.matmul %80, %66, %cst_28 {dimension_numbers = #tpu.dot_dimension_numbers<[1], [0], [0], [1], [0, 0, 1, 1], [], []>} : vector<8x8xf32>, vector<8x8xf32>, vector<8x8xf32> -> vector<8x8xf32>
    %82 = vector.extract_strided_slice %18 {offsets = [16, 0], sizes = [8, 32], strides = [1, 1]} : vector<32x32xf32> to vector<8x32xf32>
    %cst_29 = arith.constant dense<0.000000e+00> : vector<8x32xf32>
    %83 = tpu.matmul %81, %82, %cst_29 {dimension_numbers = #tpu.dot_dimension_numbers<[1], [0], [0], [1], [0, 0, 1, 1], [], []>} : vector<8x8xf32>, vector<8x32xf32>, vector<8x32xf32> -> vector<8x32xf32>
    %84 = arith.addf %63, %83 : vector<8x32xf32>
    %85 = vector.extract_strided_slice %17 {offsets = [0, 24], sizes = [8, 8], strides = [1, 1]} : vector<16x96xf32> to vector<8x8xf32>
    %86 = vector.extract_strided_slice %17 {offsets = [0, 56], sizes = [8, 8], strides = [1, 1]} : vector<16x96xf32> to vector<8x8xf32>
    %87 = vector.extract_strided_slice %17 {offsets = [0, 88], sizes = [8, 8], strides = [1, 1]} : vector<16x96xf32> to vector<8x8xf32>
    %cst_30 = arith.constant dense<0.000000e+00> : vector<8x8xf32>
    %88 = tpu.matmul %85, %86, %cst_30 {dimension_numbers = #tpu.dot_dimension_numbers<[1], [1], [0], [0], [0, 0, 1, 0], [], []>} : vector<8x8xf32>, vector<8x8xf32>, vector<8x8xf32> -> vector<8x8xf32>
    %89 = vector.extract_strided_slice %20 {offsets = [3, 0, 0], sizes = [1, 8, 8], strides = [1, 1, 1]} : vector<4x8x8xf32> to vector<1x8x8xf32>
    %90 = vector.shape_cast %89 : vector<1x8x8xf32> to vector<8x8xf32>
    %91 = arith.addf %88, %90 : vector<8x8xf32>
    %cst_31 = arith.constant dense<0xFF800000> : vector<8xf32>
    %92 = vector.multi_reduction <maximumf>, %91, %cst_31 [1] : vector<8x8xf32> to vector<8xf32>
    %93 = vector.shape_cast %92 : vector<8xf32> to vector<8x1xf32>
    %94 = vector.broadcast %93 : vector<8x1xf32> to vector<8x8xf32>
    %95 = arith.subf %91, %94 : vector<8x8xf32>
    %96 = math.exp %95 : vector<8x8xf32>
    %cst_32 = arith.constant dense<0.000000e+00> : vector<8xf32>
    %97 = vector.multi_reduction <add>, %96, %cst_32 [1] : vector<8x8xf32> to vector<8xf32>
    %98 = vector.shape_cast %97 : vector<8xf32> to vector<8x1xf32>
    %99 = tpu.reciprocal %98 {approx = true} : vector<8x1xf32> -> vector<8x1xf32>
    %100 = vector.broadcast %99 : vector<8x1xf32> to vector<8x8xf32>
    %101 = arith.mulf %96, %100 : vector<8x8xf32>
    %cst_33 = arith.constant dense<0.000000e+00> : vector<8x8xf32>
    %102 = tpu.matmul %101, %87, %cst_33 {dimension_numbers = #tpu.dot_dimension_numbers<[1], [0], [0], [1], [0, 0, 1, 1], [], []>} : vector<8x8xf32>, vector<8x8xf32>, vector<8x8xf32> -> vector<8x8xf32>
    %103 = vector.extract_strided_slice %18 {offsets = [24, 0], sizes = [8, 32], strides = [1, 1]} : vector<32x32xf32> to vector<8x32xf32>
    %cst_34 = arith.constant dense<0.000000e+00> : vector<8x32xf32>
    %104 = tpu.matmul %102, %103, %cst_34 {dimension_numbers = #tpu.dot_dimension_numbers<[1], [0], [0], [1], [0, 0, 1, 1], [], []>} : vector<8x8xf32>, vector<8x32xf32>, vector<8x32xf32> -> vector<8x32xf32>
    %105 = arith.addf %84, %104 : vector<8x32xf32>
    %cst_35 = arith.constant 0.000000e+00 : f32
    %106 = vector.broadcast %cst_35 : f32 to vector<8x32xf32>
    %107 = vector.extract_strided_slice %17 {offsets = [8, 0], sizes = [8, 8], strides = [1, 1]} : vector<16x96xf32> to vector<8x8xf32>
    %108 = vector.extract_strided_slice %17 {offsets = [8, 32], sizes = [8, 8], strides = [1, 1]} : vector<16x96xf32> to vector<8x8xf32>
    %109 = vector.extract_strided_slice %17 {offsets = [8, 64], sizes = [8, 8], strides = [1, 1]} : vector<16x96xf32> to vector<8x8xf32>
    %cst_36 = arith.constant dense<0.000000e+00> : vector<8x8xf32>
    %110 = tpu.matmul %107, %108, %cst_36 {dimension_numbers = #tpu.dot_dimension_numbers<[1], [1], [0], [0], [0, 0, 1, 0], [], []>} : vector<8x8xf32>, vector<8x8xf32>, vector<8x8xf32> -> vector<8x8xf32>
    %111 = vector.extract_strided_slice %20 {offsets = [0, 0, 0], sizes = [1, 8, 8], strides = [1, 1, 1]} : vector<4x8x8xf32> to vector<1x8x8xf32>
    %112 = vector.shape_cast %111 : vector<1x8x8xf32> to vector<8x8xf32>
    %113 = arith.addf %110, %112 : vector<8x8xf32>
    %cst_37 = arith.constant dense<0xFF800000> : vector<8xf32>
    %114 = vector.multi_reduction <maximumf>, %113, %cst_37 [1] : vector<8x8xf32> to vector<8xf32>
    %115 = vector.shape_cast %114 : vector<8xf32> to vector<8x1xf32>
    %116 = vector.broadcast %115 : vector<8x1xf32> to vector<8x8xf32>
    %117 = arith.subf %113, %116 : vector<8x8xf32>
    %118 = math.exp %117 : vector<8x8xf32>
    %cst_38 = arith.constant dense<0.000000e+00> : vector<8xf32>
    %119 = vector.multi_reduction <add>, %118, %cst_38 [1] : vector<8x8xf32> to vector<8xf32>
    %120 = vector.shape_cast %119 : vector<8xf32> to vector<8x1xf32>
    %121 = tpu.reciprocal %120 {approx = true} : vector<8x1xf32> -> vector<8x1xf32>
    %122 = vector.broadcast %121 : vector<8x1xf32> to vector<8x8xf32>
    %123 = arith.mulf %118, %122 : vector<8x8xf32>
    %cst_39 = arith.constant dense<0.000000e+00> : vector<8x8xf32>
    %124 = tpu.matmul %123, %109, %cst_39 {dimension_numbers = #tpu.dot_dimension_numbers<[1], [0], [0], [1], [0, 0, 1, 1], [], []>} : vector<8x8xf32>, vector<8x8xf32>, vector<8x8xf32> -> vector<8x8xf32>
    %125 = vector.extract_strided_slice %18 {offsets = [0, 0], sizes = [8, 32], strides = [1, 1]} : vector<32x32xf32> to vector<8x32xf32>
    %cst_40 = arith.constant dense<0.000000e+00> : vector<8x32xf32>
    %126 = tpu.matmul %124, %125, %cst_40 {dimension_numbers = #tpu.dot_dimension_numbers<[1], [0], [0], [1], [0, 0, 1, 1], [], []>} : vector<8x8xf32>, vector<8x32xf32>, vector<8x32xf32> -> vector<8x32xf32>
    %127 = arith.addf %106, %126 : vector<8x32xf32>
    %128 = vector.extract_strided_slice %17 {offsets = [8, 8], sizes = [8, 8], strides = [1, 1]} : vector<16x96xf32> to vector<8x8xf32>
    %129 = vector.extract_strided_slice %17 {offsets = [8, 40], sizes = [8, 8], strides = [1, 1]} : vector<16x96xf32> to vector<8x8xf32>
    %130 = vector.extract_strided_slice %17 {offsets = [8, 72], sizes = [8, 8], strides = [1, 1]} : vector<16x96xf32> to vector<8x8xf32>
    %cst_41 = arith.constant dense<0.000000e+00> : vector<8x8xf32>
    %131 = tpu.matmul %128, %129, %cst_41 {dimension_numbers = #tpu.dot_dimension_numbers<[1], [1], [0], [0], [0, 0, 1, 0], [], []>} : vector<8x8xf32>, vector<8x8xf32>, vector<8x8xf32> -> vector<8x8xf32>
    %132 = vector.extract_strided_slice %20 {offsets = [1, 0, 0], sizes = [1, 8, 8], strides = [1, 1, 1]} : vector<4x8x8xf32> to vector<1x8x8xf32>
    %133 = vector.shape_cast %132 : vector<1x8x8xf32> to vector<8x8xf32>
    %134 = arith.addf %131, %133 : vector<8x8xf32>
    %cst_42 = arith.constant dense<0xFF800000> : vector<8xf32>
    %135 = vector.multi_reduction <maximumf>, %134, %cst_42 [1] : vector<8x8xf32> to vector<8xf32>
    %136 = vector.shape_cast %135 : vector<8xf32> to vector<8x1xf32>
    %137 = vector.broadcast %136 : vector<8x1xf32> to vector<8x8xf32>
    %138 = arith.subf %134, %137 : vector<8x8xf32>
    %139 = math.exp %138 : vector<8x8xf32>
    %cst_43 = arith.constant dense<0.000000e+00> : vector<8xf32>
    %140 = vector.multi_reduction <add>, %139, %cst_43 [1] : vector<8x8xf32> to vector<8xf32>
    %141 = vector.shape_cast %140 : vector<8xf32> to vector<8x1xf32>
    %142 = tpu.reciprocal %141 {approx = true} : vector<8x1xf32> -> vector<8x1xf32>
    %143 = vector.broadcast %142 : vector<8x1xf32> to vector<8x8xf32>
    %144 = arith.mulf %139, %143 : vector<8x8xf32>
    %cst_44 = arith.constant dense<0.000000e+00> : vector<8x8xf32>
    %145 = tpu.matmul %144, %130, %cst_44 {dimension_numbers = #tpu.dot_dimension_numbers<[1], [0], [0], [1], [0, 0, 1, 1], [], []>} : vector<8x8xf32>, vector<8x8xf32>, vector<8x8xf32> -> vector<8x8xf32>
    %146 = vector.extract_strided_slice %18 {offsets = [8, 0], sizes = [8, 32], strides = [1, 1]} : vector<32x32xf32> to vector<8x32xf32>
    %cst_45 = arith.constant dense<0.000000e+00> : vector<8x32xf32>
    %147 = tpu.matmul %145, %146, %cst_45 {dimension_numbers = #tpu.dot_dimension_numbers<[1], [0], [0], [1], [0, 0, 1, 1], [], []>} : vector<8x8xf32>, vector<8x32xf32>, vector<8x32xf32> -> vector<8x32xf32>
    %148 = arith.addf %127, %147 : vector<8x32xf32>
    %149 = vector.extract_strided_slice %17 {offsets = [8, 16], sizes = [8, 8], strides = [1, 1]} : vector<16x96xf32> to vector<8x8xf32>
    %150 = vector.extract_strided_slice %17 {offsets = [8, 48], sizes = [8, 8], strides = [1, 1]} : vector<16x96xf32> to vector<8x8xf32>
    %151 = vector.extract_strided_slice %17 {offsets = [8, 80], sizes = [8, 8], strides = [1, 1]} : vector<16x96xf32> to vector<8x8xf32>
    %cst_46 = arith.constant dense<0.000000e+00> : vector<8x8xf32>
    %152 = tpu.matmul %149, %150, %cst_46 {dimension_numbers = #tpu.dot_dimension_numbers<[1], [1], [0], [0], [0, 0, 1, 0], [], []>} : vector<8x8xf32>, vector<8x8xf32>, vector<8x8xf32> -> vector<8x8xf32>
    %153 = vector.extract_strided_slice %20 {offsets = [2, 0, 0], sizes = [1, 8, 8], strides = [1, 1, 1]} : vector<4x8x8xf32> to vector<1x8x8xf32>
    %154 = vector.shape_cast %153 : vector<1x8x8xf32> to vector<8x8xf32>
    %155 = arith.addf %152, %154 : vector<8x8xf32>
    %cst_47 = arith.constant dense<0xFF800000> : vector<8xf32>
    %156 = vector.multi_reduction <maximumf>, %155, %cst_47 [1] : vector<8x8xf32> to vector<8xf32>
    %157 = vector.shape_cast %156 : vector<8xf32> to vector<8x1xf32>
    %158 = vector.broadcast %157 : vector<8x1xf32> to vector<8x8xf32>
    %159 = arith.subf %155, %158 : vector<8x8xf32>
    %160 = math.exp %159 : vector<8x8xf32>
    %cst_48 = arith.constant dense<0.000000e+00> : vector<8xf32>
    %161 = vector.multi_reduction <add>, %160, %cst_48 [1] : vector<8x8xf32> to vector<8xf32>
    %162 = vector.shape_cast %161 : vector<8xf32> to vector<8x1xf32>
    %163 = tpu.reciprocal %162 {approx = true} : vector<8x1xf32> -> vector<8x1xf32>
    %164 = vector.broadcast %163 : vector<8x1xf32> to vector<8x8xf32>
    %165 = arith.mulf %160, %164 : vector<8x8xf32>
    %cst_49 = arith.constant dense<0.000000e+00> : vector<8x8xf32>
    %166 = tpu.matmul %165, %151, %cst_49 {dimension_numbers = #tpu.dot_dimension_numbers<[1], [0], [0], [1], [0, 0, 1, 1], [], []>} : vector<8x8xf32>, vector<8x8xf32>, vector<8x8xf32> -> vector<8x8xf32>
    %167 = vector.extract_strided_slice %18 {offsets = [16, 0], sizes = [8, 32], strides = [1, 1]} : vector<32x32xf32> to vector<8x32xf32>
    %cst_50 = arith.constant dense<0.000000e+00> : vector<8x32xf32>
    %168 = tpu.matmul %166, %167, %cst_50 {dimension_numbers = #tpu.dot_dimension_numbers<[1], [0], [0], [1], [0, 0, 1, 1], [], []>} : vector<8x8xf32>, vector<8x32xf32>, vector<8x32xf32> -> vector<8x32xf32>
    %169 = arith.addf %148, %168 : vector<8x32xf32>
    %170 = vector.extract_strided_slice %17 {offsets = [8, 24], sizes = [8, 8], strides = [1, 1]} : vector<16x96xf32> to vector<8x8xf32>
    %171 = vector.extract_strided_slice %17 {offsets = [8, 56], sizes = [8, 8], strides = [1, 1]} : vector<16x96xf32> to vector<8x8xf32>
    %172 = vector.extract_strided_slice %17 {offsets = [8, 88], sizes = [8, 8], strides = [1, 1]} : vector<16x96xf32> to vector<8x8xf32>
    %cst_51 = arith.constant dense<0.000000e+00> : vector<8x8xf32>
    %173 = tpu.matmul %170, %171, %cst_51 {dimension_numbers = #tpu.dot_dimension_numbers<[1], [1], [0], [0], [0, 0, 1, 0], [], []>} : vector<8x8xf32>, vector<8x8xf32>, vector<8x8xf32> -> vector<8x8xf32>
    %174 = vector.extract_strided_slice %20 {offsets = [3, 0, 0], sizes = [1, 8, 8], strides = [1, 1, 1]} : vector<4x8x8xf32> to vector<1x8x8xf32>
    %175 = vector.shape_cast %174 : vector<1x8x8xf32> to vector<8x8xf32>
    %176 = arith.addf %173, %175 : vector<8x8xf32>
    %cst_52 = arith.constant dense<0xFF800000> : vector<8xf32>
    %177 = vector.multi_reduction <maximumf>, %176, %cst_52 [1] : vector<8x8xf32> to vector<8xf32>
    %178 = vector.shape_cast %177 : vector<8xf32> to vector<8x1xf32>
    %179 = vector.broadcast %178 : vector<8x1xf32> to vector<8x8xf32>
    %180 = arith.subf %176, %179 : vector<8x8xf32>
    %181 = math.exp %180 : vector<8x8xf32>
    %cst_53 = arith.constant dense<0.000000e+00> : vector<8xf32>
    %182 = vector.multi_reduction <add>, %181, %cst_53 [1] : vector<8x8xf32> to vector<8xf32>
    %183 = vector.shape_cast %182 : vector<8xf32> to vector<8x1xf32>
    %184 = tpu.reciprocal %183 {approx = true} : vector<8x1xf32> -> vector<8x1xf32>
    %185 = vector.broadcast %184 : vector<8x1xf32> to vector<8x8xf32>
    %186 = arith.mulf %181, %185 : vector<8x8xf32>
    %cst_54 = arith.constant dense<0.000000e+00> : vector<8x8xf32>
    %187 = tpu.matmul %186, %172, %cst_54 {dimension_numbers = #tpu.dot_dimension_numbers<[1], [0], [0], [1], [0, 0, 1, 1], [], []>} : vector<8x8xf32>, vector<8x8xf32>, vector<8x8xf32> -> vector<8x8xf32>
    %188 = vector.extract_strided_slice %18 {offsets = [24, 0], sizes = [8, 32], strides = [1, 1]} : vector<32x32xf32> to vector<8x32xf32>
    %cst_55 = arith.constant dense<0.000000e+00> : vector<8x32xf32>
    %189 = tpu.matmul %187, %188, %cst_55 {dimension_numbers = #tpu.dot_dimension_numbers<[1], [0], [0], [1], [0, 0, 1, 1], [], []>} : vector<8x8xf32>, vector<8x32xf32>, vector<8x32xf32> -> vector<8x32xf32>
    %190 = arith.addf %169, %189 : vector<8x32xf32>
    %191 = tpu.concatenate %105, %190 in 0 : vector<8x32xf32>, vector<8x32xf32> -> vector<16x32xf32>
    %192 = arith.addf %0, %191 : vector<16x32xf32>
    %193 = arith.mulf %192, %192 : vector<16x32xf32>
    %cst_56 = arith.constant dense<0.000000e+00> : vector<16xf32>
    %194 = vector.multi_reduction <add>, %193, %cst_56 [1] : vector<16x32xf32> to vector<16xf32>
    %195 = vector.shape_cast %194 : vector<16xf32> to vector<16x1xf32>
    %cst_57 = arith.constant 3.200000e+01 : f32
    %196 = vector.broadcast %cst_57 : f32 to vector<16x1xf32>
    %197 = arith.divf %195, %196 : vector<16x1xf32>
    %cst_58 = arith.constant 9.99999997E-7 : f32
    %198 = vector.broadcast %cst_58 : f32 to vector<16x1xf32>
    %199 = arith.addf %197, %198 : vector<16x1xf32>
    %200 = math.rsqrt %199 : vector<16x1xf32>
    %201 = vector.broadcast %200 : vector<16x1xf32> to vector<16x32xf32>
    %202 = arith.mulf %192, %201 : vector<16x32xf32>
    %c0_59 = arith.constant 0 : index
    %c0_60 = arith.constant 0 : index
    %203 = vector.load %arg4[%c0_59, %c0_60] : memref<1x32xf32, #tpu.memory_space<vmem>>, vector<1x32xf32>
    %204 = vector.shape_cast %203 : vector<1x32xf32> to vector<32xf32>
    %205 = vector.shape_cast %204 : vector<32xf32> to vector<1x32xf32>
    %206 = vector.broadcast %205 : vector<1x32xf32> to vector<16x32xf32>
    %207 = arith.mulf %202, %206 : vector<16x32xf32>
    %c0_61 = arith.constant 0 : index
    %c0_62 = arith.constant 0 : index
    %208 = vector.load %arg7[%c0_61, %c0_62] : memref<32x128xf32, #tpu.memory_space<vmem>>, vector<32x128xf32>
    %cst_63 = arith.constant dense<0.000000e+00> : vector<16x128xf32>
    %209 = tpu.matmul %207, %208, %cst_63 {dimension_numbers = #tpu.dot_dimension_numbers<[1], [0], [0], [1], [0, 0, 1, 1], [], []>} : vector<16x32xf32>, vector<32x128xf32>, vector<16x128xf32> -> vector<16x128xf32>
    %210 = vector.extract_strided_slice %209 {offsets = [0, 0], sizes = [16, 64], strides = [1, 1]} : vector<16x128xf32> to vector<16x64xf32>
    %211 = arith.mulf %210, %210 : vector<16x64xf32>
    %212 = arith.mulf %210, %211 : vector<16x64xf32>
    %cst_64 = arith.constant 4.471500e-02 : f32
    %213 = vector.broadcast %cst_64 : f32 to vector<16x64xf32>
    %214 = arith.mulf %213, %212 : vector<16x64xf32>
    %215 = arith.addf %210, %214 : vector<16x64xf32>
    %cst_65 = arith.constant 0.797884583 : f32
    %216 = vector.broadcast %cst_65 : f32 to vector<16x64xf32>
    %217 = arith.mulf %216, %215 : vector<16x64xf32>
    %218 = math.tanh %217 : vector<16x64xf32>
    %cst_66 = arith.constant 1.000000e+00 : f32
    %219 = vector.broadcast %cst_66 : f32 to vector<16x64xf32>
    %220 = arith.addf %219, %218 : vector<16x64xf32>
    %cst_67 = arith.constant 5.000000e-01 : f32
    %221 = vector.broadcast %cst_67 : f32 to vector<16x64xf32>
    %222 = arith.mulf %221, %220 : vector<16x64xf32>
    %223 = arith.mulf %210, %222 : vector<16x64xf32>
    %224 = vector.extract_strided_slice %209 {offsets = [0, 64], sizes = [16, 64], strides = [1, 1]} : vector<16x128xf32> to vector<16x64xf32>
    %225 = arith.mulf %223, %224 : vector<16x64xf32>
    %c0_68 = arith.constant 0 : index
    %c0_69 = arith.constant 0 : index
    %226 = vector.load %arg8[%c0_68, %c0_69] : memref<64x32xf32, #tpu.memory_space<vmem>>, vector<64x32xf32>
    %cst_70 = arith.constant dense<0.000000e+00> : vector<16x32xf32>
    %227 = tpu.matmul %225, %226, %cst_70 {dimension_numbers = #tpu.dot_dimension_numbers<[1], [0], [0], [1], [0, 0, 1, 1], [], []>} : vector<16x64xf32>, vector<64x32xf32>, vector<16x32xf32> -> vector<16x32xf32>
    %228 = arith.addf %192, %227 : vector<16x32xf32>
    %c0_71 = arith.constant 0 : index
    %c0_72 = arith.constant 0 : index
    %229 = vector.load %arg9[%c0_71, %c0_72] : memref<16x32xf32, #tpu.memory_space<vmem>>, vector<16x32xf32>
    tpu.vector_store %arg9[%c0_71, %c0_72], %228 {strides = array<i32>} : memref<16x32xf32, #tpu.memory_space<vmem>>, vector<16x32xf32>,
    return
  }
  func.func @transform_0(%arg0: i32) -> (i32, i32) {
    %c0_i32 = arith.constant 0 : i32
    %c0_i32_0 = arith.constant 0 : i32
    %c0_i32_1 = arith.constant 0 : i32
    return %c0_i32, %c0_i32_0 : i32, i32
  }
  func.func @transform_1(%arg0: i32) -> (i32, i32, i32, i32) {
    %c0_i32 = arith.constant 0 : i32
    %c0_i32_0 = arith.constant 0 : i32
    %c0_i32_1 = arith.constant 0 : i32
    %c0_i32_2 = arith.constant 0 : i32
    %c0_i32_3 = arith.constant 0 : i32
    return %c0_i32, %c0_i32_0, %c0_i32_1, %c0_i32_2 : i32, i32, i32, i32
  }
  func.func @transform_2(%arg0: i32) -> (i32, i32) {
    %c0_i32 = arith.constant 0 : i32
    %c0_i32_0 = arith.constant 0 : i32
    %c0_i32_1 = arith.constant 0 : i32
    return %c0_i32, %c0_i32_0 : i32, i32
  }
  func.func @transform_3(%arg0: i32) -> (i32, i32) {
    %c0_i32 = arith.constant 0 : i32
    %c0_i32_0 = arith.constant 0 : i32
    %c0_i32_1 = arith.constant 0 : i32
    return %c0_i32, %c0_i32_0 : i32, i32
  }
  func.func @transform_4(%arg0: i32) -> (i32, i32) {
    %c0_i32 = arith.constant 0 : i32
    %c0_i32_0 = arith.constant 0 : i32
    %c0_i32_1 = arith.constant 0 : i32
    return %c0_i32, %c0_i32_0 : i32, i32
  }
  func.func @transform_5(%arg0: i32) -> (i32, i32) {
    %c0_i32 = arith.constant 0 : i32
    %c0_i32_0 = arith.constant 0 : i32
    %c0_i32_1 = arith.constant 0 : i32
    return %c0_i32, %c0_i32_0 : i32, i32
  }
  func.func @transform_6(%arg0: i32) -> (i32, i32) {
    %c0_i32 = arith.constant 0 : i32
    %c0_i32_0 = arith.constant 0 : i32
    %c0_i32_1 = arith.constant 0 : i32
    return %c0_i32, %c0_i32_0 : i32, i32
  }
  func.func @transform_7(%arg0: i32) -> (i32, i32) {
    %c0_i32 = arith.constant 0 : i32
    %c0_i32_0 = arith.constant 0 : i32
    %c0_i32_1 = arith.constant 0 : i32
    return %c0_i32, %c0_i32_0 : i32, i32
  }
  func.func @transform_8(%arg0: i32) -> (i32, i32) {
    %c0_i32 = arith.constant 0 : i32
    %c0_i32_0 = arith.constant 0 : i32
    %c0_i32_1 = arith.constant 0 : i32
    return %c0_i32, %c0_i32_0 : i32, i32
  }
}

</mosaic_0001>

<bundles_post_ra>
// kernel: tpu_custom_call.1
= control target key start
LH: loop header
LB: loop body
LE: loop exit
PB: predicated region body
PF: predicated region fallthrough
CT: control target
= control target key end

     0   :  { %13 = vsyncpa [#allocation3], 0  ;;  %s3126_s0 = inlined_call_operand.hbm [shape: f32[16,32], index: 0, kind: input, shape index: {}]   ;;  %s3127_s1 = inlined_call_operand.vmem [shape: f32[1,4,8,8], index: 1, kind: input, shape index: {}]   ;;  %s3128_s2 = inlined_call_operand.vmem [shape: f32[1,32], index: 2, kind: input, shape index: {}]   ;;  %s3129_s3 = inlined_call_operand.vmem [shape: f32[1,32], index: 3, kind: input, shape index: {}]   ;;  %s3130_s4 = inlined_call_operand.vmem [shape: f32[32,96], index: 4, kind: input, shape index: {}]   ;;  %s3131_s5 = inlined_call_operand.vmem [shape: f32[32,32], index: 5, kind: input, shape index: {}]   ;;  %s3132_s6 = inlined_call_operand.hbm [shape: f32[32,128], index: 6, kind: input, shape index: {}]   ;;  %s3133_s7 = inlined_call_operand.vmem [shape: f32[64,32], index: 7, kind: input, shape index: {}]   ;;  %s3134_s8 = inlined_call_operand.hbm [shape: f32[16,32], index: 8, kind: output, shape index: {}]  }
   0x1   :  { %14 = vsyncpa [#allocation6], 0 }
   0x2   :  { %15 = vsyncpa [#allocation4], 0  ;;  %s2738_s27 = smov [#allocation2]  }
   0x3   :  { %s21_s28 = sshll.u32 %s2738_s27, 4  ;;  %s22_s28 = int_to_ptr.vmem [resolvable:$true] %s21_s28 }
   0x4   :  { %s2680_s29 = scalar_lea.vmem %s22_s28, 256  ;;  %p2685_p1 = scmp.lt.s32.totalorder %s22_s28, %s22_s28 }
   0x5   :  { %p2681_p0 = scmp.ne.s32.totalorder %s22_s28, %s2680_s29  ;;  %p2686_p2 = scmp.lt.s32.totalorder %s2680_s29, %s2680_s29 }
   0x7   :  { %p2687_p3 = por %p2686_p2, %p2685_p1 }
   0x9   :  { %p2688_p4 = pnand %p2687_p3, %p2681_p0 }
   0xb   :  { %2691 = shalt.err (!%p2688_p4)
}
   0xc   :  { %s2739_s30 = smov 128   ;;  %s2740_s9 = smov 8  }
   0xd   :  { %27 = dma.hbm_to_vmem [thread:$0]  %s3126_s0, 256, %s22_s28, [#allocation3], %s2739_s30, %s2739_s30, %s2740_s9  }
   0xe   :  { %s2741_s12 = smov [#allocation5]  }
   0xf   :  { %s43_s13 = sshll.u32 %s2741_s12, 4  ;;  %s44_s13 = int_to_ptr.vmem [resolvable:$true] %s43_s13 }
  0x10   :  { %s2700_s14 = scalar_lea.vmem %s44_s13, 512  ;;  %p2705_p6 = scmp.lt.s32.totalorder %s44_s13, %s44_s13 }
  0x11   :  { %p2701_p5 = scmp.ne.s32.totalorder %s44_s13, %s2700_s14  ;;  %p2706_p7 = scmp.lt.s32.totalorder %s2700_s14, %s2700_s14 }
  0x13   :  { %p2707_p8 = por %p2706_p7, %p2705_p6 }
  0x15   :  { %p2708_p9 = pnand %p2707_p8, %p2701_p5 }
  0x17   :  { %2711 = shalt.err (!%p2708_p9)
}
  0x18   :  { %49 = dma.hbm_to_vmem [thread:$0]  %s3132_s6, 512, %s44_s13, [#allocation6], %s2739_s30, %s2739_s30, %s2740_s9  }
  0x19   :  { %2732 = dma.done.wait [#allocation3], 256  }
  0x1a   :  { %2733 = vsyncadd [#allocation3], 4294967040 }
  0x1b   :  { %2734 = dma.done.wait [#allocation6], 512  }
  0x1c   :  { %2735 = vsyncadd [#allocation6], 4294966784  ;;  %v2813_v0 = vld [vmem:[#allocation2] sm:$0xff]  ;;  %vm62_vm0 = vcmask 261120   ;;  %v2815_v1 = vld [vmem:[#allocation2 + $0x8] sm:$0xff]  ;;  %v2742_v23 = vmov 0.0  }
  0x1d   :  { %v60_v2 = vmul.f32 %v2813_v0, %v2813_v0  ;;  %v61_v3 = vmul.f32 %v2815_v1, %v2815_v1  ;;  %v90_v6 = vld [vmem:[%s3130_s4 + $0x18] sm:$0xff]  ;;  %v89_v7 = vld [vmem:[%s3130_s4 + $0x10] sm:$0xff]  ;;  %v88_v8 = vld [vmem:[%s3130_s4 + $0x8] sm:$0xff]  ;;  %2465 = vmatprep.subr.mxu1 %v2742_v23  ;;  %vm2743_vm1 = vmmov 0   ;;  %s2746_s25 = smov 88   ;;  %vm183_vm2 = vcmask 64512  }
  0x1e   :  { %2449 = vmatprep.subr.mxu0 %v90_v6  ;;  %v87_v9 = vld [vmem:[%s3130_s4] sm:$0xff]  ;;  %2467 = vmatprep.mubr.msk.f32.mxu1 %vm2743_vm1, %v2742_v23  ;;  %s2745_s4 = smov 96   ;;  %v2878_v33 = vld [vmem:[%s3127_s1 + $0x8] sm:$0xff]  ;;  %s2747_s10 = smov 56   ;;  %vm2235_vm3 = vcmask 523264  }
  0x1f   :  { %v63_v4 = vsel %vm62_vm0, %v60_v2, 0.0  ;;  %v66_v5 = vsel %vm62_vm0, %v61_v3, 0.0  ;;  %2450 = vmatpush3.msra.mxu0 %v90_v6  ;;  %v2339_v17 = vld [vmem:[%s3128_s2] ss:$0 sm:$0xff]  ;;  %s2744_s2 = smov 120   ;;  %s2748_s11 = smov 64  }
  0x20   :  { %64 = vadd.xlane.f32.xlu0 %v63_v4  ;;  %2451 = vmatprep.subr.mxu0 %v89_v7  ;;  %v2872_v29 = vld [vmem:[%s3127_s1] sm:$0xff]  ;;  %s2749_s12 = smov 80   ;;  %s2750_s13 = smov 112   ;;  %v2910_v58 = vld [vmem:[%s3131_s5 + $0x8] sm:$0xff] }
  0x21   :  { %2452 = vmatpush3.msra.mxu0 %v89_v7  ;;  %v2904_v57 = vld [vmem:[%s3131_s5] sm:$0xff]  ;;  %s2751_s18 = smov 48   ;;  %s2752_s19 = smov 104  }
  0x22   :  { %2453 = vmatprep.subr.mxu0 %v88_v8  ;;  %s2753_s20 = smov 72  }
  0x23   :  { %2454 = vmatpush3.msra.mxu0 %v88_v8  ;;  %v2929_v8 = vld [vmem:[%s3127_s1 + $0x10] sm:$0xff] }
  0x24   :  { %67 = vadd.xlane.f32.xlu0 %v66_v5  ;;  %2455 = vmatprep.subr.mxu0 %v87_v9 }
  0x25   :  { %2456 = vmatpush3.msra.mxu0 %v87_v9 }
  0x26   :  { %2460 = vmatprep.subr.mxu0 %v2742_v23 }
  0xa9   :  { %v65_v10 = vpop.xlane.xlu0 %64 }
  0xaa   :  { %v70_v11 = vmul.f32 0.03125, %v65_v10 }
  0xac   :  { %v72_v12 = vadd.f32 1e-06, %v70_v11 }
  0xad   :  { %v68_v13 = vpop.xlane.xlu0 %67 }
  0xae   :  { %2628 = vrsqrt.f32 %v72_v12  ;;  %v71_v14 = vmul.f32 0.03125, %v68_v13 }
  0xb0   :  { %v73_v15 = vadd.f32 1e-06, %v71_v14 }
  0xb2   :  { %2630 = vrsqrt.f32 %v73_v15 }
  0xbb   :  { %v2629_v16 = vpop.eup %2628 }
  0xbc   :  { %v76_v18 = vmul.f32 %v2629_v16, %v2813_v0 }
  0xbe   :  { %v85_v19 = vmul.f32 %v2339_v17, %v76_v18 }
  0xbf   :  { %v2631_v20 = vpop.eup %2630 }
  0xc0   :  { %v77_v21 = vmul.f32 %v2631_v20, %v2815_v1  ;;  %2457 = vmatprep.mubr.msk.f32.mxu0 %vm62_vm0, %v85_v19 }
  0xc2   :  { %v86_v22 = vmul.f32 %v2339_v17, %v77_v21 }
  0xc4   :  { %2458 = vmatmul.mubr.msk.f32.vlgmr.msra.gmra.mxu0 %vm62_vm0, %v86_v22 }
  0xc5   :  { %2462 = vmatprep.mubr.msk.f32.mxu0 %vm2743_vm1, %v2742_v23 }
 0x184   :  { %v2848_v24 = vpop.f32.mrf.mxu0 }
 0x186   :  { %v2850_v25 = vpop.f32.mrf.mxu0 }
 0x187   :  { %345 = vrot.lane.b32.xlu0 %v2850_v25, %s2744_s2  ;;  %181 = vrot.lane.b32.xlu1 %v2850_v25, %s2745_s4 }
 0x18b   :  { %347 = vrot.lane.b32.xlu1 %v2850_v25, %s2746_s25 }
 0x1f9   :  { %v182_v26 = vpop.permute.xlu1 %181  ;;  %v346_v28 = vpop.permute.xlu0 %345 }
 0x1fa   :  { %2461 = vmatpush3.xpose.msk.msra.mxu0 %vm183_vm2, %v182_v26 }
 0x1fb   :  { %2470 = vmatprep.subr.mxu0 %v2742_v23 }
 0x1fd   :  { %2463 = vmatmul.mubr.msk.f32.vlgmr.msra.gmra.mxu0 %vm183_vm2, %v2850_v25  ;;  %v348_v27 = vpop.permute.xlu1 %347 }
 0x1fe   :  { %2471 = vmatpush3.xpose.msk.msra.mxu0 %vm183_vm2, %v348_v27  ;;  %2472 = vmatprep.mubr.msk.f32.mxu0 %vm2743_vm1, %v2742_v23  ;;  %v2952_v27 = vld [vmem:[%s3131_s5 + $0x10] sm:$0xff] }
 0x1ff   :  { %2480 = vmatprep.subr.mxu0 %v2742_v23 }
 0x201   :  { %2473 = vmatmul.mubr.msk.f32.vlgmr.msra.gmra.mxu0 %vm183_vm2, %v346_v28 }
 0x202   :  { %2482 = vmatprep.mubr.msk.f32.mxu0 %vm2743_vm1, %v2742_v23  ;;  %2481 = vmatpush3.msra.mxu0 %v2910_v58 }
 0x203   :  { %2490 = vmatprep.subr.mxu0 %v2742_v23 }
 0x2bd   :  { %v254_v30 = vpop.f32.mrf.mxu0 }
 0x2be   :  { %v255_v31 = vadd.f32 %v254_v30, %v2872_v29 }
 0x2bf   :  { %v2464_v32 = vpop.f32.mrf.mxu0 }
 0x2c0   :  { %v258_v34 = vsel %vm183_vm2, %v255_v31, -inf }
 0x2c1   :  { %259 = vmax.xlane.f32.xlu1 %v258_v34  ;;  %v419_v35 = vpop.f32.mrf.mxu0 }
 0x2c2   :  { %v420_v36 = vadd.f32 %v419_v35, %v2878_v33 }
 0x2c3   :  { %v2474_v37 = vpop.f32.mrf.mxu0 }
 0x2c4   :  { %v423_v38 = vsel %vm183_vm2, %v420_v36, -inf }
 0x2c5   :  { %424 = vmax.xlane.f32.xlu0 %v423_v38 }
 0x2db   :  { %434 = vrot.lane.b32.xlu0 %v2850_v25, %s2747_s10 }
 0x34a   :  { %v260_v39 = vpop.xlane.xlu1 %259 }
 0x34b   :  { %v261_v40 = vsub.f32 %v255_v31, %v260_v39  ;;  %v2960_v31 = vld [vmem:[%s3127_s1 + $0x18] sm:$0xff]  ;;  %s2754_s1 = smov 40  }
 0x34d   :  { %v262_v41 = vmul.f32 1.442695, %v261_v40 }
 0x34e   :  { %v425_v42 = vpop.xlane.xlu0 %424 }
 0x34f   :  { %2632 = vpow2.f32 %v262_v41  ;;  %v426_v43 = vsub.f32 %v420_v36, %v425_v42 }
 0x351   :  { %v427_v44 = vmul.f32 1.442695, %v426_v43 }
 0x352   :  { %v435_v54 = vpop.permute.xlu0 %434 }
 0x353   :  { %2634 = vpow2.f32 %v427_v44 }
 0x35c   :  { %v2633_v45 = vpop.eup %2632 }
 0x35d   :  { %v264_v46 = vsel %vm183_vm2, %v2633_v45, 0.0 }
 0x35e   :  { %265 = vadd.xlane.f32.xlu1 %v264_v46 }
 0x360   :  { %v2635_v47 = vpop.eup %2634 }
 0x361   :  { %v429_v48 = vsel %vm183_vm2, %v2635_v47, 0.0 }
 0x362   :  { %430 = vadd.xlane.f32.xlu1 %v429_v48 }
 0x373   :  { %269 = vrot.lane.b32.xlu1 %v2850_v25, %s2748_s11 }
 0x377   :  { %658 = vrot.lane.b32.xlu1 %v2850_v25, %s2749_s12 }
 0x37b   :  { %656 = vrot.lane.b32.xlu1 %v2850_v25, %s2750_s13 }
 0x3e7   :  { %v266_v49 = vpop.xlane.xlu1 %265 }
 0x3e8   :  { %2636 = vrcp.f32 %v266_v49 }
 0x3eb   :  { %v431_v50 = vpop.xlane.xlu1 %430 }
 0x3ec   :  { %2638 = vrcp.f32 %v431_v50 }
 0x3ef   :  { %v270_v51 = vpop.permute.xlu1 %269 }
 0x3f0   :  { %2466 = vmatpush3.msra.mxu1 %v270_v51  ;;  %v2995_v51 = vld [vmem:[%s3131_s5 + $0x18] sm:$0xff] }
 0x3f1   :  { %2475 = vmatprep.subr.mxu1 %v2742_v23 }
 0x3f3   :  { %v659_v60 = vpop.permute.xlu1 %658 }
 0x3f5   :  { %v2637_v52 = vpop.eup %2636 }
 0x3f6   :  { %v268_v53 = vmul.f32 %v2637_v52, %v2633_v45 }
 0x3f7   :  { %v657_v2 = vpop.permute.xlu1 %656 }
 0x3f8   :  { %2468 = vmatmul.mubr.msk.f32.vlgmr.msra.gmra.mxu1 %vm183_vm2, %v268_v53 }
 0x3f9   :  { %v2639_v55 = vpop.eup %2638  ;;  %2476 = vmatpush3.msra.mxu1 %v435_v54  ;;  %2477 = vmatprep.mubr.msk.f32.mxu1 %vm2743_vm1, %v2742_v23 }
 0x3fa   :  { %v433_v56 = vmul.f32 %v2639_v55, %v2635_v47  ;;  %2485 = vmatprep.subr.mxu1 %v2742_v23 }
 0x3fc   :  { %2478 = vmatmul.mubr.msk.f32.vlgmr.msra.gmra.mxu1 %vm183_vm2, %v433_v56 }
 0x3fd   :  { %2487 = vmatprep.mubr.msk.f32.mxu1 %vm2743_vm1, %v2742_v23  ;;  %2486 = vmatpush3.msra.mxu1 %v2904_v57 }
 0x3fe   :  { %2495 = vmatprep.subr.mxu1 %v2742_v23 }
 0x4b8   :  { %v341_v59 = vpop.f32.mrf.mxu1 }
 0x4b9   :  { %2488 = vmatmul.mubr.msk.f32.vlgmr.msra.gmra.mxu1 %vm183_vm2, %v341_v59 }
 0x4ba   :  { %v2469_v61 = vpop.f32.mrf.mxu1  ;;  %2497 = vmatprep.mubr.msk.f32.mxu1 %vm2743_vm1, %v2742_v23 }
 0x4bc   :  { %v506_v62 = vpop.f32.mrf.mxu1 }
 0x4bd   :  { %2483 = vmatmul.mubr.msk.f32.vlgmr.msra.gmra.mxu0 %vm183_vm2, %v506_v62 }
 0x4be   :  { %2491 = vmatpush3.xpose.msk.msra.mxu0 %vm183_vm2, %v659_v60  ;;  %v2479_v63 = vpop.f32.mrf.mxu1  ;;  %2492 = vmatprep.mubr.msk.f32.mxu0 %vm2743_vm1, %v2742_v23 }
 0x4bf   :  { %2500 = vmatprep.subr.mxu0 %v2742_v23 }
 0x4c1   :  { %2493 = vmatmul.mubr.msk.f32.vlgmr.msra.gmra.mxu0 %vm183_vm2, %v657_v2 }
 0x4c2   :  { %2502 = vmatprep.mubr.msk.f32.mxu0 %vm2743_vm1, %v2742_v23  ;;  %2501 = vmatpush3.msra.mxu0 %v2952_v27 }
 0x4c3   :  { %2510 = vmatprep.subr.mxu0 %v2742_v23 }
 0x579   :  { %v652_v3 = vpop.f32.mrf.mxu1 }
 0x57b   :  { %v2489_v4 = vpop.f32.mrf.mxu1 }
 0x57d   :  { %v579_v5 = vpop.f32.mrf.mxu0 }
 0x57e   :  { %v653_v6 = vadd.f32 %v652_v3, %v579_v5 }
 0x57f   :  { %v2484_v7 = vpop.f32.mrf.mxu0 }
 0x581   :  { %v730_v9 = vpop.f32.mrf.mxu0 }
 0x582   :  { %v731_v10 = vadd.f32 %v730_v9, %v2929_v8 }
 0x583   :  { %v2494_v11 = vpop.f32.mrf.mxu0 }
 0x584   :  { %v734_v12 = vsel %vm183_vm2, %v731_v10, -inf }
 0x585   :  { %735 = vmax.xlane.f32.xlu1 %v734_v12 }
 0x596   :  { %745 = vrot.lane.b32.xlu1 %v2850_v25, %s2751_s18 }
 0x59a   :  { %895 = vrot.lane.b32.xlu1 %v2850_v25, %s2752_s19 }
 0x60e   :  { %v736_v13 = vpop.xlane.xlu1 %735 }
 0x60f   :  { %v737_v14 = vsub.f32 %v731_v10, %v736_v13 }
 0x611   :  { %v738_v15 = vmul.f32 1.442695, %v737_v14 }
 0x612   :  { %v746_v16 = vpop.permute.xlu1 %745 }
 0x613   :  { %2640 = vpow2.f32 %v738_v15  ;;  %2496 = vmatpush3.msra.mxu1 %v746_v16 }
 0x614   :  { %2505 = vmatprep.subr.mxu1 %v2742_v23 }
 0x616   :  { %v896_v26 = vpop.permute.xlu1 %895 }
 0x620   :  { %v2641_v17 = vpop.eup %2640 }
 0x621   :  { %v740_v18 = vsel %vm183_vm2, %v2641_v17, 0.0 }
 0x622   :  { %741 = vadd.xlane.f32.xlu0 %v740_v18 }
 0x638   :  { %897 = vrot.lane.b32.xlu0 %v2850_v25, %s2753_s20 }
 0x6ab   :  { %v742_v19 = vpop.xlane.xlu0 %741 }
 0x6ac   :  { %2642 = vrcp.f32 %v742_v19 }
 0x6af   :  { %v898_v22 = vpop.permute.xlu0 %897 }
 0x6b9   :  { %v2643_v20 = vpop.eup %2642 }
 0x6ba   :  { %v744_v21 = vmul.f32 %v2643_v20, %v2641_v17 }
 0x6bc   :  { %2498 = vmatmul.mubr.msk.f32.vlgmr.msra.gmra.mxu1 %vm183_vm2, %v744_v21 }
 0x6bd   :  { %2506 = vmatpush3.xpose.msk.msra.mxu1 %vm183_vm2, %v898_v22  ;;  %2507 = vmatprep.mubr.msk.f32.mxu1 %vm2743_vm1, %v2742_v23 }
 0x6be   :  { %2515 = vmatprep.subr.mxu1 %v2742_v23 }
 0x6c0   :  { %2508 = vmatmul.mubr.msk.f32.vlgmr.msra.gmra.mxu1 %vm183_vm2, %v896_v26 }
 0x6c1   :  { %2517 = vmatprep.mubr.msk.f32.mxu1 %vm2743_vm1, %v2742_v23  ;;  %2516 = vmatpush3.msra.mxu1 %v2995_v51 }
 0x6c2   :  { %2525 = vmatprep.subr.mxu1 %v2742_v23 }
 0x77c   :  { %v817_v28 = vpop.f32.mrf.mxu1 }
 0x77d   :  { %2503 = vmatmul.mubr.msk.f32.vlgmr.msra.gmra.mxu0 %vm183_vm2, %v817_v28 }
 0x77e   :  { %v2499_v30 = vpop.f32.mrf.mxu1  ;;  %2512 = vmatprep.mubr.msk.f32.mxu0 %vm2743_vm1, %v2742_v23 }
 0x780   :  { %v969_v32 = vpop.f32.mrf.mxu1 }
 0x781   :  { %v970_v34 = vadd.f32 %v969_v32, %v2960_v31 }
 0x782   :  { %v2509_v35 = vpop.f32.mrf.mxu1 }
 0x783   :  { %v973_v36 = vsel %vm183_vm2, %v970_v34, -inf }
 0x784   :  { %974 = vmax.xlane.f32.xlu1 %v973_v36 }
 0x795   :  { %1135 = vrot.lane.b32.xlu1 %v2848_v24, %s2745_s4 }
 0x799   :  { %1300 = vrot.lane.b32.xlu1 %v2848_v24, %s2746_s25 }
 0x80d   :  { %v975_v37 = vpop.xlane.xlu1 %974 }
 0x80e   :  { %v976_v38 = vsub.f32 %v970_v34, %v975_v37 }
 0x810   :  { %v977_v39 = vmul.f32 1.442695, %v976_v38 }
 0x811   :  { %v1136_v48 = vpop.permute.xlu1 %1135 }
 0x812   :  { %2644 = vpow2.f32 %v977_v39 }
 0x81f   :  { %v2645_v40 = vpop.eup %2644 }
 0x820   :  { %v979_v41 = vsel %vm183_vm2, %v2645_v40, 0.0 }
 0x821   :  { %980 = vadd.xlane.f32.xlu0 %v979_v41 }
 0x837   :  { %984 = vrot.lane.b32.xlu0 %v2850_v25, %s2754_s1  ;;  %v1301_v25 = vpop.permute.xlu1 %1300 }
 0x83b   :  { %1298 = vrot.lane.b32.xlu0 %v2848_v24, %s2744_s2 }
 0x83d   :  { %v890_v42 = vpop.f32.mrf.mxu0 }
 0x83e   :  { %v894_v43 = vadd.f32 %v890_v42, %v653_v6 }
 0x83f   :  { %v2504_v44 = vpop.f32.mrf.mxu0 }
 0x8aa   :  { %v981_v45 = vpop.xlane.xlu0 %980 }
 0x8ab   :  { %2646 = vrcp.f32 %v981_v45 }
 0x8ae   :  { %v985_v46 = vpop.permute.xlu0 %984 }
 0x8af   :  { %2511 = vmatpush3.msra.mxu0 %v985_v46 }
 0x8b0   :  { %2520 = vmatprep.subr.mxu0 %v2742_v23 }
 0x8b2   :  { %v1299_v50 = vpop.permute.xlu0 %1298 }
 0x8b8   :  { %v2647_v47 = vpop.eup %2646 }
 0x8b9   :  { %v983_v49 = vmul.f32 %v2647_v47, %v2645_v40 }
 0x8bb   :  { %2513 = vmatmul.mubr.msk.f32.vlgmr.msra.gmra.mxu0 %vm183_vm2, %v983_v49 }
 0x8bc   :  { %2521 = vmatpush3.xpose.msk.msra.mxu0 %vm183_vm2, %v1136_v48  ;;  %2522 = vmatprep.mubr.msk.f32.mxu0 %vm2743_vm1, %v2742_v23 }
 0x8bd   :  { %2530 = vmatprep.subr.mxu0 %v2742_v23 }
 0x8bf   :  { %2523 = vmatmul.mubr.msk.f32.vlgmr.msra.gmra.mxu0 %vm183_vm2, %v2848_v24 }
 0x8c0   :  { %2531 = vmatpush3.xpose.msk.msra.mxu0 %vm183_vm2, %v1301_v25  ;;  %2532 = vmatprep.mubr.msk.f32.mxu0 %vm2743_vm1, %v2742_v23 }
 0x8c1   :  { %2540 = vmatprep.subr.mxu0 %v2742_v23 }
 0x8c3   :  { %2533 = vmatmul.mubr.msk.f32.vlgmr.msra.gmra.mxu0 %vm183_vm2, %v1299_v50 }
 0x8c4   :  { %2541 = vmatpush3.msra.mxu0 %v2910_v58  ;;  %2542 = vmatprep.mubr.msk.f32.mxu0 %vm2743_vm1, %v2742_v23 }
 0x8c5   :  { %2550 = vmatprep.subr.mxu0 %v2742_v23 }
 0x97b   :  { %v1056_v52 = vpop.f32.mrf.mxu0 }
 0x97c   :  { %2518 = vmatmul.mubr.msk.f32.vlgmr.msra.gmra.mxu1 %vm183_vm2, %v1056_v52 }
 0x97d   :  { %v2514_v53 = vpop.f32.mrf.mxu0  ;;  %2527 = vmatprep.mubr.msk.f32.mxu1 %vm2743_vm1, %v2742_v23 }
 0x97f   :  { %v1207_v54 = vpop.f32.mrf.mxu0 }
 0x980   :  { %v1208_v55 = vadd.f32 %v1207_v54, %v2872_v29 }
 0x981   :  { %v2524_v56 = vpop.f32.mrf.mxu0 }
 0x982   :  { %v1211_v58 = vsel %vm183_vm2, %v1208_v55, -inf }
 0x983   :  { %1212 = vmax.xlane.f32.xlu1 %v1211_v58  ;;  %v1372_v59 = vpop.f32.mrf.mxu0 }
 0x984   :  { %v1373_v60 = vadd.f32 %v1372_v59, %v2878_v33 }
 0x985   :  { %v2534_v61 = vpop.f32.mrf.mxu0 }
 0x986   :  { %v1376_v62 = vsel %vm183_vm2, %v1373_v60, -inf }
 0x987   :  { %1377 = vmax.xlane.f32.xlu0 %v1376_v62 }
 0xa0c   :  { %v1213_v63 = vpop.xlane.xlu1 %1212 }
 0xa0d   :  { %v1214_v2 = vsub.f32 %v1208_v55, %v1213_v63 }
 0xa0f   :  { %v1215_v3 = vmul.f32 1.442695, %v1214_v2 }
 0xa10   :  { %v1378_v4 = vpop.xlane.xlu0 %1377 }
 0xa11   :  { %2648 = vpow2.f32 %v1215_v3  ;;  %v1379_v5 = vsub.f32 %v1373_v60, %v1378_v4 }
 0xa13   :  { %v1380_v6 = vmul.f32 1.442695, %v1379_v5 }
 0xa15   :  { %2650 = vpow2.f32 %v1380_v6 }
 0xa1e   :  { %v2649_v29 = vpop.eup %2648 }
 0xa1f   :  { %v1217_v7 = vsel %vm183_vm2, %v2649_v29, 0.0 }
 0xa20   :  { %1218 = vadd.xlane.f32.xlu0 %v1217_v7 }
 0xa22   :  { %v2651_v9 = vpop.eup %2650 }
 0xa23   :  { %v1382_v10 = vsel %vm183_vm2, %v2651_v9, 0.0 }
 0xa24   :  { %1383 = vadd.xlane.f32.xlu1 %v1382_v10  ;;  %v2374_v10 = vld [vmem:[%s3129_s3] ss:$0 sm:$0xff] }
 0xa35   :  { %1387 = vrot.lane.b32.xlu1 %v2848_v24, %s2747_s10 }
 0xa36   :  { %1222 = vrot.lane.b32.xlu0 %v2848_v24, %s2748_s11 }
 0xa39   :  { %1611 = vrot.lane.b32.xlu1 %v2848_v24, %s2749_s12 }
 0xa3a   :  { %1609 = vrot.lane.b32.xlu0 %v2848_v24, %s2750_s13 }
 0xa3c   :  { %v1129_v33 = vpop.f32.mrf.mxu1 }
 0xa3d   :  { %v3016_v11 = vadd.f32 %v1129_v33, %v894_v43 }
 0xa3e   :  { %v2519_v12 = vpop.f32.mrf.mxu1 }
 0xa3f   :  { %v3069_v61 = vadd.f32 %v3016_v11, %v2813_v0 }
 0xa41   :  { %v2089_v62 = vmul.f32 %v3069_v61, %v3069_v61 }
 0xa43   :  { %v2091_v63 = vsel %vm62_vm0, %v2089_v62, 0.0 }
 0xaa9   :  { %v1219_v13 = vpop.xlane.xlu0 %1218 }
 0xaaa   :  { %2652 = vrcp.f32 %v1219_v13 }
 0xaad   :  { %v1384_v14 = vpop.xlane.xlu1 %1383  ;;  %v1223_v15 = vpop.permute.xlu0 %1222 }
 0xaae   :  { %2654 = vrcp.f32 %v1384_v14  ;;  %2526 = vmatpush3.msra.mxu1 %v1223_v15 }
 0xaaf   :  { %2535 = vmatprep.subr.mxu1 %v2742_v23 }
 0xab1   :  { %v1388_v18 = vpop.permute.xlu1 %1387 }
 0xab5   :  { %v1612_v28 = vpop.permute.xlu1 %1611 }
 0xab7   :  { %v2653_v16 = vpop.eup %2652 }
 0xab8   :  { %v1221_v17 = vmul.f32 %v2653_v16, %v2649_v29 }
 0xaba   :  { %2528 = vmatmul.mubr.msk.f32.vlgmr.msra.gmra.mxu1 %vm183_vm2, %v1221_v17 }
 0xabb   :  { %v2655_v19 = vpop.eup %2654  ;;  %2536 = vmatpush3.msra.mxu1 %v1388_v18  ;;  %2537 = vmatprep.mubr.msk.f32.mxu1 %vm2743_vm1, %v2742_v23 }
 0xabc   :  { %v1386_v20 = vmul.f32 %v2655_v19, %v2651_v9  ;;  %2545 = vmatprep.subr.mxu1 %v2742_v23 }
 0xabe   :  { %2538 = vmatmul.mubr.msk.f32.vlgmr.msra.gmra.mxu1 %vm183_vm2, %v1386_v20  ;;  %v2117_v20 = vld [vmem:[#allocation5 + $0x18] sm:$0xff] }
 0xabf   :  { %2546 = vmatpush3.msra.mxu1 %v2904_v57  ;;  %2547 = vmatprep.mubr.msk.f32.mxu1 %vm2743_vm1, %v2742_v23  ;;  %v1610_v57 = vpop.permute.xlu0 %1609 }
 0xac0   :  { %2555 = vmatprep.subr.mxu1 %v2742_v23 }
 0xb7a   :  { %v1294_v21 = vpop.f32.mrf.mxu1 }
 0xb7b   :  { %2548 = vmatmul.mubr.msk.f32.vlgmr.msra.gmra.mxu1 %vm183_vm2, %v1294_v21  ;;  %v2116_v21 = vld [vmem:[#allocation5 + $0x10] sm:$0xff] }
 0xb7c   :  { %v2529_v22 = vpop.f32.mrf.mxu1  ;;  %2557 = vmatprep.mubr.msk.f32.mxu1 %vm2743_vm1, %v2742_v23 }
 0xb7d   :  { %v2115_v22 = vld [vmem:[#allocation5 + $0x8] sm:$0xff] }
 0xb7e   :  { %v1459_v26 = vpop.f32.mrf.mxu1 }
 0xb7f   :  { %2543 = vmatmul.mubr.msk.f32.vlgmr.msra.gmra.mxu0 %vm183_vm2, %v1459_v26  ;;  %v2114_v26 = vld [vmem:[#allocation5] sm:$0xff] }
 0xb80   :  { %2551 = vmatpush3.xpose.msk.msra.mxu0 %vm183_vm2, %v1612_v28  ;;  %v2539_v30 = vpop.f32.mrf.mxu1  ;;  %2552 = vmatprep.mubr.msk.f32.mxu0 %vm2743_vm1, %v2742_v23 }
 0xb81   :  { %2560 = vmatprep.subr.mxu0 %v2742_v23 }
 0xb83   :  { %2553 = vmatmul.mubr.msk.f32.vlgmr.msra.gmra.mxu0 %vm183_vm2, %v1610_v57 }
 0xb84   :  { %2561 = vmatpush3.msra.mxu0 %v2952_v27  ;;  %2562 = vmatprep.mubr.msk.f32.mxu0 %vm2743_vm1, %v2742_v23 }
 0xb85   :  { %2570 = vmatprep.subr.mxu0 %v2742_v23 }
 0xc3b   :  { %v1605_v32 = vpop.f32.mrf.mxu1 }
 0xc3d   :  { %v2549_v34 = vpop.f32.mrf.mxu1 }
 0xc3f   :  { %v1532_v35 = vpop.f32.mrf.mxu0 }
 0xc40   :  { %v1606_v36 = vadd.f32 %v1605_v32, %v1532_v35  ;;  %v2234_v35 = vld [vmem:[%s3133_s7 + $0x38] sm:$0xff] }
 0xc41   :  { %v2544_v37 = vpop.f32.mrf.mxu0 }
 0xc42   :  { %v2232_v37 = vld [vmem:[%s3133_s7 + $0x28] sm:$0xff] }
 0xc43   :  { %v1683_v38 = vpop.f32.mrf.mxu0 }
 0xc44   :  { %v1684_v39 = vadd.f32 %v1683_v38, %v2929_v8  ;;  %v2231_v38 = vld [vmem:[%s3133_s7 + $0x20] sm:$0xff] }
 0xc45   :  { %v2554_v40 = vpop.f32.mrf.mxu0 }
 0xc46   :  { %v1687_v41 = vsel %vm183_vm2, %v1684_v39, -inf  ;;  %v2229_v40 = vld [vmem:[%s3133_s7 + $0x10] sm:$0xff] }
 0xc47   :  { %1688 = vmax.xlane.f32.xlu1 %v1687_v41  ;;  %v2228_v41 = vld [vmem:[%s3133_s7 + $0x8] sm:$0xff] }
 0xc58   :  { %1850 = vrot.lane.b32.xlu1 %v2848_v24, %s2753_s20 }
 0xc5c   :  { %1848 = vrot.lane.b32.xlu1 %v2848_v24, %s2752_s19 }
 0xcd0   :  { %v1689_v27 = vpop.xlane.xlu1 %1688 }
 0xcd1   :  { %v1690_v42 = vsub.f32 %v1684_v39, %v1689_v27  ;;  %v2230_v39 = vld [vmem:[%s3133_s7 + $0x18] sm:$0xff]  ;;  %v2227_v27 = vld [vmem:[%s3133_s7] sm:$0xff] }
 0xcd3   :  { %v1691_v43 = vmul.f32 1.442695, %v1690_v42 }
 0xcd4   :  { %v1851_v48 = vpop.permute.xlu1 %1850 }
 0xcd5   :  { %2656 = vpow2.f32 %v1691_v43 }
 0xcd8   :  { %v1849_v25 = vpop.permute.xlu1 %1848 }
 0xce2   :  { %v2657_v44 = vpop.eup %2656 }
 0xce3   :  { %v1693_v45 = vsel %vm183_vm2, %v2657_v44, 0.0 }
 0xce4   :  { %1694 = vadd.xlane.f32.xlu0 %v1693_v45 }
 0xcfa   :  { %1698 = vrot.lane.b32.xlu0 %v2848_v24, %s2751_s18 }
 0xd6d   :  { %v1695_v8 = vpop.xlane.xlu0 %1694 }
 0xd6e   :  { %2658 = vrcp.f32 %v1695_v8 }
 0xd71   :  { %v1699_v46 = vpop.permute.xlu0 %1698 }
 0xd72   :  { %2556 = vmatpush3.msra.mxu1 %v1699_v46 }
 0xd73   :  { %2565 = vmatprep.subr.mxu1 %v2742_v23 }
 0xd7b   :  { %v2659_v47 = vpop.eup %2658 }
 0xd7c   :  { %v1697_v49 = vmul.f32 %v2659_v47, %v2657_v44 }
 0xd7e   :  { %2558 = vmatmul.mubr.msk.f32.vlgmr.msra.gmra.mxu1 %vm183_vm2, %v1697_v49 }
 0xd7f   :  { %2566 = vmatpush3.xpose.msk.msra.mxu1 %vm183_vm2, %v1851_v48  ;;  %2567 = vmatprep.mubr.msk.f32.mxu1 %vm2743_vm1, %v2742_v23 }
 0xd80   :  { %2575 = vmatprep.subr.mxu1 %v2742_v23 }
 0xd82   :  { %2568 = vmatmul.mubr.msk.f32.vlgmr.msra.gmra.mxu1 %vm183_vm2, %v1849_v25 }
 0xd83   :  { %2576 = vmatpush3.msra.mxu1 %v2995_v51  ;;  %2577 = vmatprep.mubr.msk.f32.mxu1 %vm2743_vm1, %v2742_v23 }
 0xd84   :  { %2591 = vmatprep.subr.mxu1 %v2234_v35 }
 0xe3e   :  { %v1770_v50 = vpop.f32.mrf.mxu1 }
 0xe3f   :  { %2563 = vmatmul.mubr.msk.f32.vlgmr.msra.gmra.mxu0 %vm183_vm2, %v1770_v50 }
 0xe40   :  { %v2559_v52 = vpop.f32.mrf.mxu1  ;;  %2572 = vmatprep.mubr.msk.f32.mxu0 %vm2743_vm1, %v2742_v23 }
 0xe42   :  { %v1922_v53 = vpop.f32.mrf.mxu1 }
 0xe43   :  { %v1923_v54 = vadd.f32 %v1922_v53, %v2960_v31 }
 0xe44   :  { %v2569_v55 = vpop.f32.mrf.mxu1 }
 0xe45   :  { %v1926_v56 = vsel %vm183_vm2, %v1923_v54, -inf }
 0xe46   :  { %1927 = vmax.xlane.f32.xlu0 %v1926_v56 }
 0xe5c   :  { %1937 = vrot.lane.b32.xlu0 %v2848_v24, %s2754_s1 }
 0xecf   :  { %v1928_v51 = vpop.xlane.xlu0 %1927 }
 0xed0   :  { %v1929_v58 = vsub.f32 %v1923_v54, %v1928_v51 }
 0xed2   :  { %v1930_v59 = vmul.f32 1.442695, %v1929_v58 }
 0xed3   :  { %v1938_v60 = vpop.permute.xlu0 %1937 }
 0xed4   :  { %2660 = vpow2.f32 %v1930_v59  ;;  %2571 = vmatpush3.msra.mxu0 %v1938_v60 }
 0xed5   :  { %2580 = vmatprep.subr.mxu0 %v2117_v20 }
 0xee1   :  { %v2661_v23 = vpop.eup %2660 }
 0xee2   :  { %v1932_v31 = vsel %vm183_vm2, %v2661_v23, 0.0 }
 0xee3   :  { %1933 = vadd.xlane.f32.xlu1 %v1932_v31 }
 0xee7   :  { %2092 = vadd.xlane.f32.xlu1 %v2091_v63 }
 0xeff   :  { %v1843_v24 = vpop.f32.mrf.mxu0 }
 0xf00   :  { %v1847_v2 = vadd.f32 %v1843_v24, %v1606_v36  ;;  %v2233_v36 = vld [vmem:[%s3133_s7 + $0x30] sm:$0xff]  ;;  %s2755_s7 = smov [#allocation7]  }
 0xf01   :  { %v2564_v3 = vpop.f32.mrf.mxu0 }
 0xf6c   :  { %v1934_v4 = vpop.xlane.xlu1 %1933 }
 0xf6d   :  { %2662 = vrcp.f32 %v1934_v4 }
 0xf70   :  { %v2093_v5 = vpop.xlane.xlu1 %2092 }
 0xf71   :  { %v2097_v6 = vmul.f32 0.03125, %v2093_v5 }
 0xf73   :  { %v2099_v29 = vadd.f32 1e-06, %v2097_v6 }
 0xf75   :  { %2664 = vrsqrt.f32 %v2099_v29 }
 0xf7a   :  { %v2663_v0 = vpop.eup %2662 }
 0xf7b   :  { %v1936_v7 = vmul.f32 %v2663_v0, %v2661_v23 }
 0xf7d   :  { %2573 = vmatmul.mubr.msk.f32.vlgmr.msra.gmra.mxu0 %vm183_vm2, %v1936_v7 }
 0xf7e   :  { %2581 = vmatpush3.msra.mxu0 %v2117_v20 }
 0xf7f   :  { %2582 = vmatprep.subr.mxu0 %v2116_v21 }
 0xf80   :  { %2583 = vmatpush3.msra.mxu0 %v2116_v21 }
 0xf81   :  { %2584 = vmatprep.subr.mxu0 %v2115_v22 }
 0xf82   :  { %v2665_v9 = vpop.eup %2664  ;;  %2585 = vmatpush3.msra.mxu0 %v2115_v22 }
 0xf83   :  { %v2103_v33 = vmul.f32 %v2665_v9, %v3069_v61  ;;  %2586 = vmatprep.subr.mxu0 %v2114_v26 }
 0xf84   :  { %2587 = vmatpush3.msra.mxu0 %v2114_v26 }
 0xf85   :  { %v2112_v11 = vmul.f32 %v2374_v10, %v2103_v33 }
 0xf87   :  { %2588 = vmatprep.mubr.msk.f32.mxu0 %vm62_vm0, %v2112_v11 }
0x103d   :  { %v2009_v12 = vpop.f32.mrf.mxu0 }
0x103e   :  { %2578 = vmatmul.mubr.msk.f32.vlgmr.msra.gmra.mxu1 %vm183_vm2, %v2009_v12 }
0x103f   :  { %v2574_v13 = vpop.f32.mrf.mxu0  ;;  %2592 = vmatpush3.msra.mxu1 %v2234_v35 }
0x1040   :  { %2593 = vmatprep.subr.mxu1 %v2233_v36 }
0x1041   :  { %2594 = vmatpush3.msra.mxu1 %v2233_v36 }
0x1042   :  { %2595 = vmatprep.subr.mxu1 %v2232_v37 }
0x1043   :  { %2596 = vmatpush3.msra.mxu1 %v2232_v37 }
0x1044   :  { %2597 = vmatprep.subr.mxu1 %v2231_v38 }
0x1045   :  { %2598 = vmatpush3.msra.mxu1 %v2231_v38 }
0x1046   :  { %2599 = vmatprep.subr.mxu1 %v2230_v39 }
0x1047   :  { %2600 = vmatpush3.msra.mxu1 %v2230_v39 }
0x1048   :  { %2601 = vmatprep.subr.mxu1 %v2229_v40 }
0x1049   :  { %2602 = vmatpush3.msra.mxu1 %v2229_v40 }
0x104a   :  { %2603 = vmatprep.subr.mxu1 %v2228_v41 }
0x104b   :  { %2604 = vmatpush3.msra.mxu1 %v2228_v41 }
0x104c   :  { %2605 = vmatprep.subr.mxu1 %v2227_v27 }
0x104d   :  { %2606 = vmatpush3.msra.mxu1 %v2227_v27 }
0x10fe   :  { %v2082_v14 = vpop.f32.mrf.mxu1 }
0x10ff   :  { %v2086_v15 = vadd.f32 %v2082_v14, %v1847_v2 }
0x1100   :  { %v2579_v16 = vpop.f32.mrf.mxu1 }
0x1101   :  { %v3083_v17 = vadd.f32 %v2086_v15, %v2815_v1 }
0x1103   :  { %v2090_v18 = vmul.f32 %v3083_v17, %v3083_v17 }
0x1105   :  { %v2094_v19 = vsel %vm62_vm0, %v2090_v18, 0.0 }
0x1106   :  { %2095 = vadd.xlane.f32.xlu1 %v2094_v19 }
0x118f   :  { %v2096_v1 = vpop.xlane.xlu1 %2095 }
0x1190   :  { %v2098_v28 = vmul.f32 0.03125, %v2096_v1 }
0x1192   :  { %v2100_v30 = vadd.f32 1e-06, %v2098_v28 }
0x1194   :  { %2666 = vrsqrt.f32 %v2100_v30 }
0x11a1   :  { %v2667_v57 = vpop.eup %2666 }
0x11a2   :  { %v2104_v32 = vmul.f32 %v2667_v57, %v3083_v17 }
0x11a4   :  { %v2113_v34 = vmul.f32 %v2374_v10, %v2104_v32 }
0x11a6   :  { %2589 = vmatmul.mubr.msk.f32.vlgmr.msra.gmra.mxu0 %vm62_vm0, %v2113_v34 }
0x1266   :  { %v2590_v42 = vpop.f32.mrf.mxu0 }
0x1267   :  { %2221 = vrot.lane.b32.xlu0 %v2590_v42, %s2748_s11  ;;  %v2200_v45 = vmul.f32 %v2590_v42, %v2590_v42 }
0x1268   :  { %v2190_v43 = vpop.f32.mrf.mxu0 }
0x1269   :  { %2219 = vrot.lane.b32.xlu1 %v2190_v43, %s2748_s11  ;;  %v2199_v44 = vmul.f32 %v2190_v43, %v2190_v43  ;;  %v2202_v46 = vmul.f32 %v2590_v42, %v2200_v45  ;;  %s2326_s11 = sshll.u32 %s2755_s7, 4  ;;  %s2327_s11 = int_to_ptr.vmem [resolvable:$true] %s2326_s11 }
0x126a   :  { %s2712_s20 = scalar_lea.vmem %s2327_s11, 256  ;;  %p2717_p11 = scmp.lt.s32.totalorder %s2327_s11, %s2327_s11 }
0x126b   :  { %v2201_v8 = vmul.f32 %v2199_v44, %v2190_v43  ;;  %v2204_v48 = vmul.f32 0.044715, %v2202_v46  ;;  %p2713_p10 = scmp.ne.s32.totalorder %s2327_s11, %s2712_s20  ;;  %p2718_p12 = scmp.lt.s32.totalorder %s2712_s20, %s2712_s20 }
0x126d   :  { %v2203_v47 = vmul.f32 0.044715, %v2201_v8  ;;  %v2206_v25 = vadd.f32 %v2590_v42, %v2204_v48  ;;  %p2719_p13 = por %p2718_p12, %p2717_p11 }
0x126f   :  { %v2205_v49 = vadd.f32 %v2203_v47, %v2190_v43  ;;  %v2208_v52 = vmul.f32 0.7978846, %v2206_v25  ;;  %p2720_p0 = pnand %p2719_p13, %p2713_p10 }
0x1271   :  { %v2207_v50 = vmul.f32 0.7978846, %v2205_v49 }
0x1273   :  { %2668 = vtanh.f32 %v2207_v50 }
0x1274   :  { %2670 = vtanh.f32 %v2208_v52 }
0x1280   :  { %v2669_v53 = vpop.eup %2668 }
0x1281   :  { %v2671_v54 = vpop.eup %2670  ;;  %v2211_v55 = vadd.f32 1.0, %v2669_v53 }
0x1282   :  { %v2212_v56 = vadd.f32 1.0, %v2671_v54 }
0x1283   :  { %v2213_v51 = vmul.f32 0.5, %v2211_v55 }
0x1284   :  { %v2214_v58 = vmul.f32 0.5, %v2212_v56 }
0x1285   :  { %v2215_v60 = vmul.f32 %v2213_v51, %v2190_v43 }
0x1286   :  { %v2216_v23 = vmul.f32 %v2590_v42, %v2214_v58 }
0x12d9   :  { %v2222_v59 = vpop.permute.xlu0 %2221 }
0x12da   :  { %v2226_v63 = vmul.f32 %v2222_v59, %v2216_v23 }
0x12db   :  { %v2220_v31 = vpop.permute.xlu1 %2219 }
0x12dc   :  { %v2225_v62 = vmul.f32 %v2220_v31, %v2215_v60 }
0x12de   :  { %2607 = vmatprep.mubr.msk.f32.mxu1 %vm2235_vm3, %v2225_v62 }
0x12df   :  { %2608 = vmatmul.mubr.msk.f32.vlgmr.msra.gmra.mxu1 %vm2235_vm3, %v2226_v63 }
0x139f   :  { %v2609_v24 = vpop.f32.mrf.mxu1 }
0x13a0   :  { %v2318_v2 = vadd.f32 %v2609_v24, %v3083_v17 }
0x13a1   :  { %v2308_v3 = vpop.f32.mrf.mxu1 }
0x13a2   :  { %2320 = vst.msk [vmem:[#allocation7 + $0x8] sm:$0xff] %vm62_vm0, %v2318_v2  ;;  %v2317_v4 = vadd.f32 %v2308_v3, %v3069_v61 }
0x13a4   :  { %2319 = vst.msk [vmem:[#allocation7] sm:$0xff] %vm62_vm0, %v2317_v4 }
0x13a5   :  { %2723 = shalt.err (!%p2720_p0)
}
0x13a6   :  { %2332 = dma.vmem_to_hbm [thread:$0]  %s2327_s11, 256, %s3134_s8, [#allocation4], %s2739_s30, %s2739_s30, %s2740_s9  }
0x13a7   :  { %2736 = dma.done.wait [#allocation4], 256  }
0x13a8   :  { %2737 = vsyncadd [#allocation4], 4294967040 }
0x13a9   :  { %2336 = vsyncpa [#allocation3], 1 }
0x13aa   :  { %2337 = vsyncpa [#allocation6], 1 }
0x13ab   :  { %2338 = vsyncpa [#allocation4], 1 }

</bundles_post_ra>
